<compile_context>
chip_gen: v7x
topology: tpu7x:2x2x1
jax: 0.10.0
libtpu: 0.0.40
codegen_flags: <defaults>
</compile_context>

<pallas_src>
import jax
import jax.numpy as jnp
from jax.experimental import pallas as pl
from jax.experimental.pallas import tpu as pltpu

IGNORE_INDEX = -100


def _wce_kernel(logits_ref, targets_ref, w_ref, out_ref, num_acc, den_acc):
    """Weighted cross-entropy partial reduction (lane-dense over samples).

    logits_ref : (C, TN)   logits tile in native dtype (upcast to f32 in-kernel)
    targets_ref: (1, TN)   int32 labels (IGNORE_INDEX for ignored / padded rows)
    w_ref      : (C,)      f32 class weights, whole array resident in SMEM
    out_ref    : (8, 128)  f32 per-split partial: row 0 = numerator, row 1 = denominator
    num_acc    : (1, TN)   f32 VMEM per-lane numerator accumulator
    den_acc    : (1, TN)   f32 VMEM per-lane denominator accumulator
    """
    i = pl.program_id(1)

    @pl.when(i == 0)
    def _():
        num_acc[...] = jnp.zeros_like(num_acc)
        den_acc[...] = jnp.zeros_like(den_acc)

    x = logits_ref[...].astype(jnp.float32)            # (C, TN)
    tgt = targets_ref[...]                             # (1, TN) int32
    c, tn = x.shape

    # One-hot over the class (sublane) axis; all-zero for ignored / out-of-range rows.
    cls = jax.lax.broadcasted_iota(jnp.int32, (c, tn), 0)
    onehot = (cls == tgt).astype(jnp.float32)          # (C, TN)

    # Numerically stable logsumexp over classes (short sublane reduction; exp/log -> EUP).
    m = jnp.max(x, axis=0, keepdims=True)              # (1, TN)
    lse = m + jnp.log(jnp.sum(jnp.exp(x - m), axis=0, keepdims=True))

    # x_n[t_n] (0 for ignored rows because onehot is all-zero there).
    picked = jnp.sum(onehot * x, axis=0, keepdims=True)

    # w[t_n] gathered from SMEM scalars via a short unrolled select (0 if ignored).
    row_w = jnp.zeros((1, tn), dtype=jnp.float32)
    for cc in range(c):
        row_w = row_w + jnp.where(tgt == cc, w_ref[cc], jnp.float32(0.0))

    # Per-lane partial accumulation (pure VPU in the steady state).
    num_acc[...] += row_w * (lse - picked)
    den_acc[...] += row_w

    # Single cross-lane reduce per core-split, only in the epilogue.
    @pl.when(i == pl.num_programs(1) - 1)
    def _():
        num = jnp.sum(num_acc[...])
        den = jnp.sum(den_acc[...])
        row = jax.lax.broadcasted_iota(jnp.int32, (8, 128), 0)
        out_ref[...] = jnp.where(row == 0, num, jnp.where(row == 1, den, 0.0))


def _pick_block_n(n, c, itemsize, num_splits):
    """Lane-tile width: multiple of 128, big enough to amortize the ~0.35us per-step
    overhead, small enough to stay well inside VMEM on every TPU generation."""
    budget_bytes = 1 << 20                                   # ~1 MiB of logits per buffer
    bn = (budget_bytes // max(1, c * itemsize)) // 128 * 128
    bn = int(max(128, min(bn, 8192)))
    # Don't tile wider than each core-split's share of the (padded) batch.
    per_split = pl.cdiv(n, num_splits)
    bn = min(bn, int(max(128, pl.cdiv(per_split, 128) * 128)))
    return bn


def adaptive_cross_entropy_loss(logits, targets, class_weights, *,
                                block_n=None, num_core_splits=2):
    """logits: (N, C) float (any float dtype, no host-side upcast), targets: (N,) int,
    class_weights: (C,) -> scalar f32 mean weighted NLL.

    Matches nn.CrossEntropyLoss(weight=class_weights, ignore_index=-100, reduction='mean').
    NOTE: if every target is IGNORE_INDEX the denominator is 0 and the result is NaN,
    matching PyTorch's behaviour for an all-ignored batch.
    """
    n, c = logits.shape
    itemsize = logits.dtype.itemsize
    if block_n is None:
        block_n = _pick_block_n(n, c, itemsize, num_core_splits)
    assert block_n % 128 == 0, "block_n must be a multiple of 128 (lane width)"

    chunk = num_core_splits * block_n
    n_pad = int(chunk * pl.cdiv(n, chunk))
    tiles_per_split = n_pad // chunk
    pad = n_pad - n

    # Lane-dense layout: samples on the 128-lane axis, classes on the sublane axis.
    # Padded rows carry IGNORE_INDEX so they contribute exactly zero to num and den.
    logits_t = jnp.pad(logits, ((0, pad), (0, 0))).T                       # (C, n_pad), native dtype
    targets_p = jnp.pad(targets.astype(jnp.int32), (0, pad),
                        constant_values=IGNORE_INDEX).reshape(1, n_pad)    # (1, n_pad)
    w = class_weights.astype(jnp.float32).reshape(c)                       # (C,) -> SMEM

    # VMEM budget: double-buffered logits + targets tiles plus the per-lane accumulators,
    # with generous headroom for sublane padding.  Capped so it is valid on v7x (64 MiB).
    tile_bytes = block_n * (c * itemsize + 4)
    vmem_limit = int(min(64 * 1024 * 1024,
                         max(16 * 1024 * 1024, 8 * (2 * tile_bytes + 2 * block_n * 4))))

    partials = pl.pallas_call(
        _wce_kernel,
        out_shape=jax.ShapeDtypeStruct((num_core_splits * 8, 128), jnp.float32),
        grid_spec=pltpu.PrefetchScalarGridSpec(
            num_scalar_prefetch=0,
            grid=(num_core_splits, tiles_per_split),
            in_specs=[
                pl.BlockSpec((c, block_n),
                             lambda s, i, _t=tiles_per_split: (0, s * _t + i)),
                pl.BlockSpec((1, block_n),
                             lambda s, i, _t=tiles_per_split: (0, s * _t + i)),
                pl.BlockSpec(memory_space=pltpu.MemorySpace.SMEM),
            ],
            out_specs=pl.BlockSpec((8, 128), lambda s, i: (s, 0)),
            scratch_shapes=[
                pltpu.VMEM((1, block_n), jnp.float32),   # per-lane numerator partials
                pltpu.VMEM((1, block_n), jnp.float32),   # per-lane denominator partials
            ],
        ),
        compiler_params=pltpu.CompilerParams(
            dimension_semantics=("parallel", "arbitrary"),
            vmem_limit_bytes=vmem_limit,
        ),
    )(logits_t, targets_p, w)

    parts = partials.reshape(num_core_splits, 8, 128)
    num = jnp.sum(parts[:, 0, 0])
    den = jnp.sum(parts[:, 1, 0])
    return num / den


# TODO(synk): iterating a torch Dataset to build the label histogram has no Pallas
# equivalent; the class-weight computation is done host-side from a {label: count} dict.
def calculate_class_weights(label_counts):
    """Mirror of AdaptiveCrossEntropyLoss.calculate_class_weights given a
    {label: count} dict (synthetic stand-in for iterating the dataset)."""
    class_weights = [1.0, 1.0]
    total_counts_1_2_3 = sum(label_counts.get(i, 0) for i in range(1, 4))
    for i in range(2, 4):
        cnt = label_counts.get(i, 0)
        weight = total_counts_1_2_3 / cnt if cnt > 0 else 1.0
        class_weights.append(weight)
    min_weight = min(class_weights)
    return jnp.array([w / min_weight for w in class_weights], dtype=jnp.float32)


def _reference_loss(logits, targets, class_weights):
    """Pure-JAX reference matching nn.CrossEntropyLoss(weight, ignore_index, 'mean')."""
    valid = (targets != IGNORE_INDEX)
    safe_t = jnp.where(valid, targets, 0)
    logp = jax.nn.log_softmax(logits.astype(jnp.float32), axis=-1)
    nll = -jnp.take_along_axis(logp, safe_t[:, None], axis=1)[:, 0]
    w = class_weights[safe_t] * valid.astype(jnp.float32)
    return jnp.sum(w * nll) / jnp.sum(w)


if __name__ == "__main__":
    key = jax.random.PRNGKey(0)
    k_logits, k_tgt = jax.random.split(key)

    N, C = 16, 4  # 4 classes, as implied by calculate_class_weights
    logits = jax.random.normal(k_logits, (N, C), dtype=jnp.float32)
    targets = jax.random.randint(k_tgt, (N,), 0, C, dtype=jnp.int32)
    # exercise ignore_index on a couple of rows
    targets = targets.at[3].set(IGNORE_INDEX).at[11].set(IGNORE_INDEX)

    # deterministic synthetic dataset label histogram (instead of iterating a Dataset)
    label_counts = {0: 40, 1: 30, 2: 10, 3: 20}
    class_weights = calculate_class_weights(label_counts)  # -> [1., 1., 6., 3.]
    print("Adaptive loss weight: ", class_weights)

    # float32 path
    loss = adaptive_cross_entropy_loss(logits, targets, class_weights)
    loss = jax.block_until_ready(loss)
    ref = _reference_loss(logits, targets, class_weights)
    assert jnp.allclose(loss, ref, rtol=1e-5, atol=1e-5), (loss, ref)

    # bf16 path: logits DMA'd in native bf16 and upcast in-kernel (halves HBM bytes)
    logits_bf16 = logits.astype(jnp.bfloat16)
    loss_bf16 = jax.block_until_ready(
        adaptive_cross_entropy_loss(logits_bf16, targets, class_weights))
    ref_bf16 = _reference_loss(logits_bf16, targets, class_weights)
    assert jnp.allclose(loss_bf16, ref_bf16, rtol=1e-4, atol=1e-4), (loss_bf16, ref_bf16)

    print("KERNEL_OK")
</pallas_src>

<mosaic_0001>
module attributes {stable_mosaic.version = 11 : i64} {
  func.func @_wce_kernel(%arg0: i32, %arg1: i32, %arg2: memref<4x128xf32, #tpu.memory_space<vmem>>, %arg3: memref<1x128xi32, #tpu.memory_space<vmem>>, %arg4: memref<4xf32, #tpu.memory_space<smem>>, %arg5: memref<8x128xf32, #tpu.memory_space<vmem>>, %arg6: memref<1x128xf32, #tpu.memory_space<vmem>>, %arg7: memref<1x128xf32, #tpu.memory_space<vmem>>) attributes {dimension_semantics = [#tpu.dimension_semantics<parallel>, #tpu.dimension_semantics<arbitrary>], iteration_bounds = array<i64: 2, 1>, scalar_prefetch = 0 : i64, scratch_operands = 2 : i64, tpu.core_type = #tpu.core_type<tc>, window_params = [{transform_indices = @transform_0, window_bounds = array<i64: 4, 128>}, {transform_indices = @transform_1, window_bounds = array<i64: 1, 128>}, {transform_indices = @transform_2, window_bounds = array<i64: 4>}, {transform_indices = @transform_3, window_bounds = array<i64: 8, 128>}]} {
    %c0_i32 = arith.constant 0 : i32
    %0 = arith.cmpi eq, %arg1, %c0_i32 : i32
    %1 = arith.extui %0 : i1 to i32
    %c0_i32_0 = arith.constant 0 : i32
    %2 = arith.cmpi ne, %1, %c0_i32_0 : i32
    scf.if %2 {
      %cst_23 = arith.constant 0.000000e+00 : f32
      %62 = vector.broadcast %cst_23 : f32 to vector<1x128xf32>
      %c0_24 = arith.constant 0 : index
      %c0_25 = arith.constant 0 : index
      %63 = vector.load %arg6[%c0_24, %c0_25] : memref<1x128xf32, #tpu.memory_space<vmem>>, vector<1x128xf32>
      tpu.vector_store %arg6[%c0_24, %c0_25], %62 {strides = array<i32>} : memref<1x128xf32, #tpu.memory_space<vmem>>, vector<1x128xf32>,
      %cst_26 = arith.constant 0.000000e+00 : f32
      %64 = vector.broadcast %cst_26 : f32 to vector<1x128xf32>
      %c0_27 = arith.constant 0 : index
      %c0_28 = arith.constant 0 : index
      %65 = vector.load %arg7[%c0_27, %c0_28] : memref<1x128xf32, #tpu.memory_space<vmem>>, vector<1x128xf32>
      tpu.vector_store %arg7[%c0_27, %c0_28], %64 {strides = array<i32>} : memref<1x128xf32, #tpu.memory_space<vmem>>, vector<1x128xf32>,
    } else {
    }
    %c0 = arith.constant 0 : index
    %c0_1 = arith.constant 0 : index
    %3 = vector.load %arg2[%c0, %c0_1] : memref<4x128xf32, #tpu.memory_space<vmem>>, vector<4x128xf32>
    %c0_2 = arith.constant 0 : index
    %c0_3 = arith.constant 0 : index
    %4 = vector.load %arg3[%c0_2, %c0_3] : memref<1x128xi32, #tpu.memory_space<vmem>>, vector<1x128xi32>
    %5 = tpu.iota {dimensions = array<i32: 0>} : vector<4x128xi32>
    %6 = vector.broadcast %4 : vector<1x128xi32> to vector<4x128xi32>
    %7 = arith.cmpi eq, %5, %6 : vector<4x128xi32>
    %8 = arith.extui %7 : vector<4x128xi1> to vector<4x128xi32>
    %9 = arith.sitofp %8 : vector<4x128xi32> to vector<4x128xf32>
    %cst = arith.constant dense<0xFF800000> : vector<128xf32>
    %10 = vector.multi_reduction <maximumf>, %3, %cst [0] : vector<4x128xf32> to vector<128xf32>
    %11 = vector.shape_cast %10 : vector<128xf32> to vector<1x128xf32>
    %12 = vector.broadcast %11 : vector<1x128xf32> to vector<4x128xf32>
    %13 = arith.subf %3, %12 : vector<4x128xf32>
    %14 = math.exp %13 : vector<4x128xf32>
    %cst_4 = arith.constant dense<0.000000e+00> : vector<128xf32>
    %15 = vector.multi_reduction <add>, %14, %cst_4 [0] : vector<4x128xf32> to vector<128xf32>
    %16 = vector.shape_cast %15 : vector<128xf32> to vector<1x128xf32>
    %17 = math.log %16 : vector<1x128xf32>
    %18 = arith.addf %11, %17 : vector<1x128xf32>
    %19 = arith.mulf %9, %3 : vector<4x128xf32>
    %cst_5 = arith.constant dense<0.000000e+00> : vector<128xf32>
    %20 = vector.multi_reduction <add>, %19, %cst_5 [0] : vector<4x128xf32> to vector<128xf32>
    %21 = vector.shape_cast %20 : vector<128xf32> to vector<1x128xf32>
    %cst_6 = arith.constant 0.000000e+00 : f32
    %22 = vector.broadcast %cst_6 : f32 to vector<1x128xf32>
    %c0_i32_7 = arith.constant 0 : i32
    %23 = vector.broadcast %c0_i32_7 : i32 to vector<1x128xi32>
    %24 = arith.cmpi eq, %4, %23 : vector<1x128xi32>
    %c0_8 = arith.constant 0 : index
    %25 = memref.load %arg4[%c0_8] : memref<4xf32, #tpu.memory_space<smem>>
    %cst_9 = arith.constant 0.000000e+00 : f32
    %26 = vector.broadcast %25 : f32 to vector<1x128xf32>
    %27 = vector.broadcast %cst_9 : f32 to vector<1x128xf32>
    %28 = arith.select %24, %26, %27 : vector<1x128xi1>, vector<1x128xf32>
    %29 = arith.addf %22, %28 : vector<1x128xf32>
    %c1_i32 = arith.constant 1 : i32
    %30 = vector.broadcast %c1_i32 : i32 to vector<1x128xi32>
    %31 = arith.cmpi eq, %4, %30 : vector<1x128xi32>
    %c1 = arith.constant 1 : index
    %32 = memref.load %arg4[%c1] : memref<4xf32, #tpu.memory_space<smem>>
    %cst_10 = arith.constant 0.000000e+00 : f32
    %33 = vector.broadcast %32 : f32 to vector<1x128xf32>
    %34 = vector.broadcast %cst_10 : f32 to vector<1x128xf32>
    %35 = arith.select %31, %33, %34 : vector<1x128xi1>, vector<1x128xf32>
    %36 = arith.addf %29, %35 : vector<1x128xf32>
    %c2_i32 = arith.constant 2 : i32
    %37 = vector.broadcast %c2_i32 : i32 to vector<1x128xi32>
    %38 = arith.cmpi eq, %4, %37 : vector<1x128xi32>
    %c2 = arith.constant 2 : index
    %39 = memref.load %arg4[%c2] : memref<4xf32, #tpu.memory_space<smem>>
    %cst_11 = arith.constant 0.000000e+00 : f32
    %40 = vector.broadcast %39 : f32 to vector<1x128xf32>
    %41 = vector.broadcast %cst_11 : f32 to vector<1x128xf32>
    %42 = arith.select %38, %40, %41 : vector<1x128xi1>, vector<1x128xf32>
    %43 = arith.addf %36, %42 : vector<1x128xf32>
    %c3_i32 = arith.constant 3 : i32
    %44 = vector.broadcast %c3_i32 : i32 to vector<1x128xi32>
    %45 = arith.cmpi eq, %4, %44 : vector<1x128xi32>
    %c3 = arith.constant 3 : index
    %46 = memref.load %arg4[%c3] : memref<4xf32, #tpu.memory_space<smem>>
    %cst_12 = arith.constant 0.000000e+00 : f32
    %47 = vector.broadcast %46 : f32 to vector<1x128xf32>
    %48 = vector.broadcast %cst_12 : f32 to vector<1x128xf32>
    %49 = arith.select %45, %47, %48 : vector<1x128xi1>, vector<1x128xf32>
    %50 = arith.addf %43, %49 : vector<1x128xf32>
    %c0_13 = arith.constant 0 : index
    %c0_14 = arith.constant 0 : index
    %51 = vector.load %arg6[%c0_13, %c0_14] : memref<1x128xf32, #tpu.memory_space<vmem>>, vector<1x128xf32>
    %52 = arith.subf %18, %21 : vector<1x128xf32>
    %53 = arith.mulf %50, %52 : vector<1x128xf32>
    %54 = arith.addf %51, %53 : vector<1x128xf32>
    %c0_15 = arith.constant 0 : index
    %c0_16 = arith.constant 0 : index
    %55 = vector.load %arg6[%c0_15, %c0_16] : memref<1x128xf32, #tpu.memory_space<vmem>>, vector<1x128xf32>
    tpu.vector_store %arg6[%c0_15, %c0_16], %54 {strides = array<i32>} : memref<1x128xf32, #tpu.memory_space<vmem>>, vector<1x128xf32>,
    %c0_17 = arith.constant 0 : index
    %c0_18 = arith.constant 0 : index
    %56 = vector.load %arg7[%c0_17, %c0_18] : memref<1x128xf32, #tpu.memory_space<vmem>>, vector<1x128xf32>
    %57 = arith.addf %56, %50 : vector<1x128xf32>
    %c0_19 = arith.constant 0 : index
    %c0_20 = arith.constant 0 : index
    %58 = vector.load %arg7[%c0_19, %c0_20] : memref<1x128xf32, #tpu.memory_space<vmem>>, vector<1x128xf32>
    tpu.vector_store %arg7[%c0_19, %c0_20], %57 {strides = array<i32>} : memref<1x128xf32, #tpu.memory_space<vmem>>, vector<1x128xf32>,
    %c0_i32_21 = arith.constant 0 : i32
    %59 = arith.cmpi eq, %arg1, %c0_i32_21 : i32
    %60 = arith.extui %59 : i1 to i32
    %c0_i32_22 = arith.constant 0 : i32
    %61 = arith.cmpi ne, %60, %c0_i32_22 : i32
    scf.if %61 {
      %c0_23 = arith.constant 0 : index
      %c0_24 = arith.constant 0 : index
      %62 = vector.load %arg6[%c0_23, %c0_24] : memref<1x128xf32, #tpu.memory_space<vmem>>, vector<1x128xf32>
      %63 = vector.shape_cast %62 : vector<1x128xf32> to vector<1x1x128xf32>
      %cst_25 = arith.constant dense<0.000000e+00> : vector<1xf32>
      %64 = vector.multi_reduction <add>, %63, %cst_25 [1, 2] : vector<1x1x128xf32> to vector<1xf32>
      %65 = vector.shape_cast %64 : vector<1xf32> to vector<1x1x1xf32>
      %66 = vector.extract %65[0, 0, 0] : f32 from vector<1x1x1xf32>
      %c0_26 = arith.constant 0 : index
      %c0_27 = arith.constant 0 : index
      %67 = vector.load %arg7[%c0_26, %c0_27] : memref<1x128xf32, #tpu.memory_space<vmem>>, vector<1x128xf32>
      %68 = vector.shape_cast %67 : vector<1x128xf32> to vector<1x1x128xf32>
      %cst_28 = arith.constant dense<0.000000e+00> : vector<1xf32>
      %69 = vector.multi_reduction <add>, %68, %cst_28 [1, 2] : vector<1x1x128xf32> to vector<1xf32>
      %70 = vector.shape_cast %69 : vector<1xf32> to vector<1x1x1xf32>
      %71 = vector.extract %70[0, 0, 0] : f32 from vector<1x1x1xf32>
      %72 = tpu.iota {dimensions = array<i32: 0>} : vector<8x128xi32>
      %c0_i32_29 = arith.constant 0 : i32
      %73 = vector.broadcast %c0_i32_29 : i32 to vector<8x128xi32>
      %74 = arith.cmpi eq, %72, %73 : vector<8x128xi32>
      %c1_i32_30 = arith.constant 1 : i32
      %75 = vector.broadcast %c1_i32_30 : i32 to vector<8x128xi32>
      %76 = arith.cmpi eq, %72, %75 : vector<8x128xi32>
      %cst_31 = arith.constant 0.000000e+00 : f32
      %77 = vector.broadcast %71 : f32 to vector<8x128xf32>
      %78 = vector.broadcast %cst_31 : f32 to vector<8x128xf32>
      %79 = arith.select %76, %77, %78 : vector<8x128xi1>, vector<8x128xf32>
      %80 = vector.broadcast %66 : f32 to vector<8x128xf32>
      %81 = arith.select %74, %80, %79 : vector<8x128xi1>, vector<8x128xf32>
      %c0_32 = arith.constant 0 : index
      %c0_33 = arith.constant 0 : index
      %82 = vector.load %arg5[%c0_32, %c0_33] : memref<8x128xf32, #tpu.memory_space<vmem>>, vector<8x128xf32>
      tpu.vector_store %arg5[%c0_32, %c0_33], %81 {strides = array<i32>} : memref<8x128xf32, #tpu.memory_space<vmem>>, vector<8x128xf32>,
    } else {
    }
    return
  }
  func.func @transform_0(%arg0: i32, %arg1: i32) -> (i32, i32) {
    %c1_i32 = arith.constant 1 : i32
    %0 = arith.muli %arg0, %c1_i32 : i32
    %1 = arith.addi %0, %arg1 : i32
    %c0_i32 = arith.constant 0 : i32
    %c0_i32_0 = arith.constant 0 : i32
    return %c0_i32, %1 : i32, i32
  }
  func.func @transform_1(%arg0: i32, %arg1: i32) -> (i32, i32) {
    %c1_i32 = arith.constant 1 : i32
    %0 = arith.muli %arg0, %c1_i32 : i32
    %1 = arith.addi %0, %arg1 : i32
    %c0_i32 = arith.constant 0 : i32
    %c0_i32_0 = arith.constant 0 : i32
    return %c0_i32, %1 : i32, i32
  }
  func.func @transform_2(%arg0: i32, %arg1: i32) -> i32 {
    %c0_i32 = arith.constant 0 : i32
    %c0_i32_0 = arith.constant 0 : i32
    return %c0_i32 : i32
  }
  func.func @transform_3(%arg0: i32, %arg1: i32) -> (i32, i32) {
    %c0_i32 = arith.constant 0 : i32
    %c0_i32_0 = arith.constant 0 : i32
    return %arg0, %c0_i32 : i32, i32
  }
}

</mosaic_0001>

<bundles_post_ra>
// kernel: tpu_custom_call.1
= control target key start
LH: loop header
LB: loop body
LE: loop exit
PB: predicated region body
PF: predicated region fallthrough
CT: control target
= control target key end

     0   :  { %8 = vsyncpa [#allocation5], 0  ;;  %s930_s0 = inlined_call_operand.hbm [shape: f32[4,256], index: 0, kind: input, shape index: {}]   ;;  %s931_s1 = inlined_call_operand.vmem [shape: s32[1,256], index: 1, kind: input, shape index: {}]   ;;  %s932_s2 = inlined_call_operand.vmem [shape: f32[4], index: 2, kind: input, shape index: {}]   ;;  %s933_s3 = inlined_call_operand.hbm [shape: f32[16,128], index: 3, kind: output, shape index: {}]  }
   0x1   :  { %10 = vsyncpa [#allocation5 + $0x1], 0 }
   0x2   :  { %11 = vsyncpa [#allocation7], 0 }
   0x3   :  { %12 = vsyncpa [#allocation6], 0 }
   0x4   :  { %14 = vsyncpa [#allocation6 + $0x1], 0  ;;  %s716_s12 = smov 0   ;;  %s718_s13 = smov 0  }
   0x5   :  { %s720_s14 = smov 0   ;;  %s722_s15 = smov 0  }
   0x6   :  { %s724_s16 = smov 0   ;;  %s726_s17 = smov 0  }
   0x7 LB: > { %s458_s18 = sadd.s32 4294967295, %s690_s17   ;;  %s459_s19 = sadd.s32 4294967294, %s690_s17   ;;  %s690_s17 = sphi %s726_s17, %s20_s17   ;;  %s686_s16 = sphi %s724_s16, %s955_s16   ;;  %s682_s15 = sphi %s722_s15, %s954_s15   ;;  %s678_s14 = sphi %s720_s14, %s953_s14   ;;  %s674_s13 = sphi %s718_s13, %s952_s13   ;;  %s670_s12 = sphi %s716_s12, %s951_s12  }
   0x8   : > { %p54_p0 = scmp.ne.s32.totalorder %s674_s13, %s670_s12  ;;  %p750_p1 = scmp.eq.s32.totalorder %s458_s18, 0 }
   0x9   : > { %p754_p2 = scmp.eq.s32.totalorder %s458_s18, 1  ;;  %p133_p3 = scmp.eq.s32.totalorder %s459_s19, 1 }
   0xa   : > { %s938_s20 = scalar_select %p750_p1, 1, 0 }
   0xb   : > { %p760_p4 = por %p750_p1, %p54_p0  ;;  %p460_p5 = scmp.ge.s32.totalorder %s690_s17, 1 }
   0xc   : > { %p765_p6 = por %p133_p3, %p54_p0  ;;  %p140_p7 = scmp.lt.s32.totalorder %s690_s17, 3 }
   0xd   : > { %s940_s22 = scalar_select %p760_p4, 1, 0 }
   0xe   : > { %s941_s23 = scalar_select %p765_p6, 1, 0 }
   0xf   : > { %s153_s26 = sshll.u32 %s932_s2, 4  ;;  %p773_p8 = pnand %p460_p5, %p140_p7  ;;  %s154_s26 = int_to_ptr.vmem [resolvable:$true] %s153_s26 }
  0x10   : > { %s32_s29 = sadd.s32 1, %s686_s16  ;;  %s41_s30 = sadd.s32 1, %s678_s14 }
  0x11   : > { %p489_p10 = pneg %p773_p8  ;;  %p34_p12 = scmp.ge.s32.totalorder %s32_s29, 2 }
  0x12   : > { %s559_s4 = scalar_lea.vmem %s154_s26, 16  ;;  %p567_p7 = scmp.lt.s32.totalorder %s154_s26, %s154_s26 }
  0x13   : > { %p782_p11 = pnand %p489_p10, %p750_p1  ;;  %p560_p13 = scmp.ne.s32.totalorder %s154_s26, %s559_s4 }
  0x14   : > { %p568_p6 = scmp.lt.s32.totalorder %s559_s4, %s559_s4 }
  0x15   : > { %p561_p0 = pneg %p782_p11 }
  0x16   : > { %p569_p9 = por %p568_p6, %p567_p7 }
  0x17   : > { %p562_p3 = pnand %p561_p0, %p560_p13 }
  0x19   : > { %p563_p5 = pneg %p562_p3 }
  0x1b   : > { %p570_p4 = pnand %p569_p9, %p563_p5 }
  0x1d   : > { %573 = shalt.err (!%p570_p4)
}
  0x1e   : > { %s692_s5 = smov [#allocation8]   ;;  %s957_s29 = smov (%p34_p12, %s32_s29), 0 }
  0x1f   : > { %492 = dma.vmem_to_smem (!%p782_p11), %s154_s26, 16, %s692_s5, [#allocation7]  }
  0x20   : > { %p48_p10 = scmp.ne.s32.totalorder %s678_s14, %s674_s13  ;;  %p49_p6 = scmp.eq.s32.totalorder %s690_s17, 0 }
  0x21   : > { %s38_s6 = ssub.s32 %s686_s16, %s957_s29  ;;  %p502_p4 = scmp.lt.s32.totalorder %s690_s17, 2 }
  0x22   : > { %p39_p9 = scmp.eq.s32.totalorder %s38_s6, 0  ;;  %p50_p13 = por %p49_p6, %p48_p10 }
  0x23   : > { %p802_p0 = por %p754_p2, %p48_p10  ;;  %s164_s8 = sand.u32 1, %s678_s14  }
  0x24   : > { %s808_s9 = scalar_select %p39_p9, %s678_s14, %s41_s30  }
  0x25   : > { %s944_s7 = scalar_select %p802_p0, 1, 0 }
  0x26   : > { %s463_s10 = sshll.u32 %s164_s8, 2  ;;  %s464_s11 = sshll.u32 %s686_s16, 6 }
  0x27   : > { %s814_s24 = scalar_lea.hbm %s930_s0, %s464_s11  ;;  %s168_s25 = scalar_lea.vmem [#allocation4], %s463_s10 }
  0x28   : > { %s176_s21 = sshll.u32 %s168_s25, 4  ;;  %p818_p2 = pnand %p502_p4, %p50_p13  ;;  %s816_s21 = int_to_ptr.vmem [resolvable:$true] %s176_s21 }
  0x29   : > { %s165_s28 = scalar_lea.sflag [#allocation5], %s164_s8  ;;  %s574_s30 = scalar_lea.hbm %s814_s24, 64 }
  0x2a   : > { %p575_p11 = scmp.ne.s32.totalorder %s814_s24, %s574_s30  ;;  %p576_p12 = pneg %p818_p2 }
  0x2b   : > { %s579_s6 = scalar_lea.hbm %s930_s0, 128  ;;  %p580_p7 = scmp.lt.u32.totalorder %s814_s24, %s930_s0 }
  0x2c   : > { %p577_p3 = pnand %p576_p12, %p575_p11  ;;  %p581_p10 = scmp.lt.u32.totalorder %s579_s6, %s574_s30 }
  0x2d   : > { %p583_p4 = scmp.lt.u32.totalorder %s574_s30, %s814_s24 }
  0x2e   : > { %p578_p5 = pneg %p577_p3  ;;  %p582_p6 = por %p581_p10, %p580_p7 }
  0x30   : > { %p584_p9 = por %p583_p4, %p582_p6 }
  0x32   : > { %p585_p13 = pnand %p584_p9, %p578_p5 }
  0x34   : > { %588 = shalt.err (!%p585_p13)
}
  0x35   : > { %s589_s8 = scalar_lea.vmem %s816_s21, 64  ;;  %s693_s18 = smov [#allocation4]  }
  0x36   : > { %p590_p11 = scmp.ne.s32.totalorder %s816_s21, %s589_s8  ;;  %s594_s19 = sshll.u32 %s693_s18, 4  ;;  %s595_s19 = int_to_ptr.vmem [resolvable:$false] %s594_s19 }
  0x37   : > { %s596_s25 = scalar_lea.vmem %s595_s19, 128  ;;  %p597_p1 = scmp.lt.s32.totalorder %s816_s21, %s595_s19 }
  0x38   : > { %p592_p3 = pnand %p590_p11, %p576_p12  ;;  %p598_p7 = scmp.lt.s32.totalorder %s596_s25, %s589_s8 }
  0x3a   : > { %p593_p0 = pneg %p592_p3  ;;  %p599_p10 = por %p598_p7, %p597_p1 }
  0x3c   : > { %p600_p6 = pnand %p599_p10, %p593_p0 }
  0x3e   : > { %603 = shalt.err (!%p600_p6)
}
  0x3f   : > { %496 = dma.hbm_to_vmem [thread:$0]  (!%p818_p2), %s814_s24, 64, %s816_s21, %s165_s28  }
  0x40   : > { %193 = sbr.rel (%p773_p8) target bundleno = 374 (0x176), region = 32  ;;  %s850_s30 = sand.u32 (!%p773_p8), 1, %s674_s13  }
  0x41   : > { %s466_s4 = sshll.u32 (!%p773_p8), %s850_s30, 2  ;;  %s196_s5 = scalar_lea.sflag (!%p773_p8), [#allocation5], %s850_s30 }
  0x42   : > { %s199_s6 = scalar_lea.vmem (!%p773_p8), [#allocation4], %s466_s4  ;;  %p946_p1 = scmp.ne.s32.totalorder (!%p773_p8), %s940_s22, 0 }
  0x47   : > { %657 = dma.done.wait (%p946_p1), %s196_s5, 64  }
  0x48   : > { %659 = vsyncadd (%p946_p1), %s196_s5, 4294967232  ;;  %p947_p0 = scmp.ne.s32.totalorder %s938_s20, 0 }
  0x4a   : > { %661 = dma.done.wait (%p947_p0), [#allocation7], 16  }
  0x4b   : > { %663 = vsyncadd (%p947_p0), [#allocation7], 4294967280 }
  0x4c   : > { %208 = sfence }
  0x4d   : > { %p233_p8 = scmp.lt.s32.totalorder %s682_s15, 1  ;;  %v243_v0 = vld [vmem:[%s199_s6] sm:$0xf]  ;;  %vm254_vm0 = vcmask 1043456   ;;  %v694_v1 = vmov 0.0   ;;  %s284_s27 = sld [smem:[#allocation8]]  ;;  %v245_v4 = vlaneseq }
  0x4e   : > { %241 = vst [vmem:[#allocation2] sm:$0x1] %v694_v1  ;;  %v255_v2 = vsel %vm254_vm0, %v243_v0, -inf  ;;  %s470_s24 = sld [smem:[#allocation8 + $0x1]]  ;;  %242 = vst [vmem:[#allocation3] sm:$0x1] %v694_v1 }
  0x4f   : > { %s234_s22 = scalar_select %p233_p8, %s682_s15, 1  ;;  %v256_v3 = vrot.slane %v255_v2, 4  ;;  %v868_v10 = vshrl.u32 %v245_v4, 7  ;;  %vm315_vm6 = vcmask 1040384  }
  0x50   : > { %s471_s21 = sld [smem:[#allocation8 + $0x2]]  ;;  %s472_s26 = sld [smem:[#allocation8 + $0x3]] }
  0x51   : > { %s235_s10 = scalar_lea.vmem %s931_s1, %s234_s22  ;;  %v257_v5 = vmax.f32 %v255_v2, %v256_v3  ;;  %v249_v21 = vsub.s32 0, %v868_v10  ;;  %s468_s11 = sshll.u32 %s850_s30, 3  ;;  %vm338_vm7 = vcmp.eq.s32.totalorder %v868_v10, 1  ;;  %vm337_vm8 = vcmp.eq.s32.totalorder %v868_v10, 0 }
  0x52   : > { %v244_v6 = vld [vmem:[%s235_s10] sm:$0x1]  ;;  %s474_s8 = sshll.u32 %s682_s15, 7  ;;  %s230_s19 = scalar_lea.vmem [#allocation9], %s468_s11 }
  0x53   : > { %v258_v7 = vrot.slane %v257_v5, 2  ;;  %vm283_vm1 = vcmp.eq.s32.totalorder %v244_v6, 0  ;;  %vm288_vm2 = vcmp.eq.s32.totalorder %v244_v6, 1  ;;  %v285_v8 = vstv %s284_s27  ;;  %s358_s25 = sshll.u32 %s230_s19, 4  ;;  %s881_s27 = scalar_lea.hbm %s933_s3, %s474_s8  ;;  %s883_s25 = int_to_ptr.vmem [resolvable:$true] %s358_s25 }
  0x54   : > { %v290_v9 = vstv %s470_s24  ;;  %vm293_vm3 = vcmp.eq.s32.totalorder %v244_v6, 2  ;;  %vm298_vm4 = vcmp.eq.s32.totalorder %v244_v6, 3  ;;  %v286_v12 = vsel %vm283_vm1, %v285_v8, 0.0  ;;  %s345_s15 = scalar_lea.sflag [#allocation6], %s850_s30  ;;  %s604_s24 = scalar_lea.vmem %s883_s25, 128 }
  0x55   : > { %v259_v11 = vmax.f32 %v257_v5, %v258_v7  ;;  %v291_v13 = vsel %vm288_vm2, %v290_v9, 0.0  ;;  %v308_v23 = vld [vmem:[#allocation3] sm:$0x1]  ;;  %v250_v27 = vrot.slane %v244_v6, %v249_v21  ;;  %v303_v50 = vld [vmem:[#allocation2] sm:$0x1]  ;;  %p605_p2 = scmp.ne.s32.totalorder %s883_s25, %s604_s24  ;;  %p948_p12 = scmp.ne.s32.totalorder %s944_s7, 0 }
  0x56   : > { %v292_v14 = vadd.f32 %v291_v13, %v286_v12  ;;  %v295_v15 = vstv %s471_s21  ;;  %v300_v16 = vstv %s472_s26  ;;  %s695_s22 = smov [#allocation9]  }
  0x57   : > { %v260_v17 = vrot.slane %v259_v11, 1  ;;  %v296_v18 = vsel %vm293_vm3, %v295_v15, 0.0  ;;  %v301_v19 = vsel %vm298_vm4, %v300_v16, 0.0  ;;  %vm251_vm5 = vcmp.eq.s32.totalorder %v868_v10, %v250_v27  ;;  %p606_p5 = pnand %p605_p2, %p948_p12  ;;  %s608_s21 = sshll.u32 %s695_s22, 4  ;;  %s609_s21 = int_to_ptr.vmem [resolvable:$false] %s608_s21 }
  0x58   : > { %v297_v20 = vadd.f32 %v296_v18, %v292_v14  ;;  %v469_v29 = vsel %vm251_vm5, 1.0, %v694_v1  ;;  %s610_s26 = scalar_lea.vmem %s609_s21, 256  ;;  %p611_p9 = scmp.lt.s32.totalorder %s883_s25, %s609_s21 }
  0x59   : > { %v261_v22 = vmax.f32 %v259_v11, %v260_v17  ;;  %v275_v30 = vmul.f32 %v469_v29, %v243_v0  ;;  %p607_p4 = pneg %p606_p5  ;;  %p612_p13 = scmp.lt.s32.totalorder %s610_s26, %s604_s24 }
  0x5a   : > { %v302_v24 = vadd.f32 %v301_v19, %v297_v20 }
  0x5b   : > { %v262_v25 = vsub.f32 %v243_v0, %v261_v22  ;;  %v276_v34 = vsel %vm254_vm0, %v275_v30, 0.0  ;;  %p613_p11 = por %p612_p13, %p611_p9 }
  0x5c   : > { %v309_v26 = vadd.f32 %v308_v23, %v302_v24  ;;  %v277_v36 = vrot.slane %v276_v34, 4 }
  0x5d   : > { %v263_v28 = vmul.f32 1.442695, %v262_v25  ;;  %p614_p3 = pnand %p613_p11, %p607_p4 }
  0x5e   : > { %310 = vst [vmem:[#allocation3] sm:$0x1] %v309_v26  ;;  %v278_v39 = vadd.f32 %v277_v36, %v276_v34 }
  0x5f   : > { %555 = vpow2.f32 %v263_v28 }
  0x60   : > { %v279_v42 = vrot.slane %v278_v39, 2 }
  0x62   : > { %v280_v43 = vadd.f32 %v279_v42, %v278_v39 }
  0x64   : > { %v281_v44 = vrot.slane %v280_v43, 1 }
  0x65   : > { %v326_v54 = vld [vmem:[#allocation3] sm:$0x1] }
  0x66   : > { %v282_v47 = vadd.f32 %v281_v44, %v280_v43  ;;  %v327_v56 = vsel %vm315_vm6, %v326_v54, 0.0 }
  0x69   : > { %v556_v31 = vpop.eup %555 }
  0x6a   : > { %v265_v32 = vsel %vm254_vm0, %v556_v31, 0.0 }
  0x6b   : > { %v266_v33 = vrot.slane %v265_v32, 4 }
  0x6d   : > { %v267_v35 = vadd.f32 %v266_v33, %v265_v32 }
  0x6f   : > { %v268_v37 = vrot.slane %v267_v35, 2 }
  0x71   : > { %v269_v38 = vadd.f32 %v268_v37, %v267_v35 }
  0x73   : > { %v270_v40 = vrot.slane %v269_v38, 1 }
  0x75   : > { %v271_v41 = vadd.f32 %v270_v40, %v269_v38 }
  0x77   : > { %557 = vlog2.f32 %v271_v41 }
  0x81   : > { %v558_v45 = vpop.eup %557 }
  0x82   : > { %v273_v46 = vmul.f32 0.6931472, %v558_v45 }
  0x84   : > { %v274_v48 = vadd.f32 %v273_v46, %v261_v22 }
  0x86   : > { %v304_v49 = vsub.f32 %v274_v48, %v282_v47 }
  0x88   : > { %v305_v51 = vmul.f32 %v304_v49, %v302_v24 }
  0x8a   : > { %v306_v52 = vadd.f32 %v305_v51, %v303_v50 }
  0x8c   : > { %307 = vst [vmem:[#allocation2] sm:$0x1] %v306_v52 }
  0x93   : > { %v314_v53 = vld [vmem:[#allocation2] sm:$0x1] }
  0x94   : > { %v316_v55 = vsel %vm315_vm6, %v314_v53, 0.0 }
  0x95   : > { %317 = vadd.xlane.f32.xlu0 %v316_v55 }
  0x99   : > { %328 = vadd.xlane.f32.xlu0 %v327_v56 }
 0x122   : > { %v318_v57 = vpop.xlane.xlu0 %317 }
 0x123   : > { %v319_v58 = vrot.slane %v318_v57, 4 }
 0x125   : > { %v320_v59 = vadd.f32 %v319_v58, %v318_v57 }
 0x126   : > { %v329_v60 = vpop.xlane.xlu0 %328 }
 0x127   : > { %v321_v61 = vrot.slane %v320_v59, 2  ;;  %v330_v62 = vrot.slane %v329_v60, 4 }
 0x129   : > { %v331_v63 = vadd.f32 %v330_v62, %v329_v60  ;;  %v322_v0 = vadd.f32 %v321_v61, %v320_v59 }
 0x12b   : > { %v332_v1 = vrot.slane %v331_v63, 2  ;;  %v323_v2 = vrot.slane %v322_v0, 1 }
 0x12d   : > { %v333_v3 = vadd.f32 %v332_v1, %v331_v63  ;;  %v324_v4 = vadd.f32 %v323_v2, %v322_v0 }
 0x12f   : > { %477 = vpush %v324_v4  ;;  %v334_v5 = vrot.slane %v333_v3, 1 }
 0x131   : > { %v335_v6 = vadd.f32 %v334_v5, %v333_v3 }
 0x133   : > { %479 = vpush %v335_v6 }
 0x160   : > { %s478_s18 = spop %477 }
 0x161   : > { %v341_v8 = vstv %s478_s18 }
 0x164   : > { %s480_s4 = spop %479 }
 0x165   : > { %v339_v7 = vstv %s480_s4 }
 0x166   : > { %v340_v9 = vsel %vm338_vm7, %v339_v7, 0.0 }
 0x167   : > { %v342_v11 = vsel %vm337_vm8, %v341_v8, %v340_v9 }
 0x168   : > { %343 = vst [vmem:[%s230_s19] sm:$0xff] %v342_v11 }
 0x169   : > { %617 = shalt.err (!%p614_p3)
}
 0x16a   : > { %s618_s30 = scalar_lea.hbm %s881_s27, 128  ;;  %s622_s10 = scalar_lea.hbm %s933_s3, 256 }
 0x16b   : > { %p619_p7 = scmp.ne.s32.totalorder %s881_s27, %s618_s30  ;;  %p623_p1 = scmp.lt.u32.totalorder %s881_s27, %s933_s3 }
 0x16c   : > { %p624_p0 = scmp.lt.u32.totalorder %s622_s10, %s618_s30  ;;  %p626_p2 = scmp.lt.u32.totalorder %s618_s30, %s881_s27 }
 0x16d   : > { %p620_p10 = pnand %p619_p7, %p948_p12 }
 0x16e   : > { %p625_p8 = por %p624_p0, %p623_p1 }
 0x16f   : > { %p621_p6 = pneg %p620_p10 }
 0x170   : > { %p627_p5 = por %p626_p2, %p625_p8 }
 0x172   : > { %p628_p4 = pnand %p627_p5, %p621_p6 }
 0x174   : > { %631 = shalt.err (!%p628_p4)
}
 0x175   : > { %487 = dma.vmem_to_hbm [thread:$0]  (%p948_p12), %s883_s25, 128, %s881_s27, %s345_s15  }
 0x176 PF: > { %s370_s18 = sand.u32 1, %s670_s12   ;;  %p949_p9 = scmp.ne.s32.totalorder %s941_s23, 0 }
 0x177   : > { %p950_p13 = scmp.ge.s32.totalorder %s690_s17, 2  ;;  %s371_s19 = scalar_lea.sflag [#allocation6], %s370_s18 }
 0x179   : > { %p498_p11 = pnand %p950_p13, %p949_p9 }
 0x17b   : > { %665 = dma.done.wait (!%p498_p11), %s371_s19, 128  }
 0x17c   : > { %667 = vsyncadd (!%p498_p11), %s371_s19, 4294967168  ;;  %s20_s17 = sadd.s32 1, %s690_s17   ;;  %s951_s12 = smov %s674_s13 }
 0x17d   : > { %p17_p3 = scmp.ge.s32.totalorder %s20_s17, 4   ;;  %s952_s13 = smov %s678_s14 }
 0x17e   : > { %s953_s14 = smov %s808_s9  ;;  %s954_s15 = smov %s686_s16 }
 0x17f   : > { %s955_s16 = smov %s957_s29  ;;  %19 = sbr.rel (!%p17_p3) target bundleno = 7 (0x7), region = 93 }
 0x186   :  { %376 = vsyncpa [#allocation5], 1 }
 0x187   :  { %378 = vsyncpa [#allocation5 + $0x1], 1 }
 0x188   :  { %379 = vsyncpa [#allocation6], 1 }
 0x189   :  { %381 = vsyncpa [#allocation6 + $0x1], 1 }
 0x18a   :  { %382 = vsyncpa [#allocation7], 1 }
 0x18b   :  { %384 = vsyncpa [#allocation7 + $0x1], 1 }

</bundles_post_ra>
